<compile_context>
chip_gen: v7x
topology: tpu7x:2x2x1
jax: 0.10.0
libtpu: 0.0.40
codegen_flags: <defaults>
</compile_context>

<pallas_src>
import functools
import math

import jax
import jax.numpy as jnp
import numpy as np
from jax.experimental import pallas as pl
from jax.experimental.pallas import tpu as pltpu


def _vmem_limit_bytes():
    cap = 128 * 1024 * 1024
    try:
        info = pltpu.get_tpu_info()
        cap = getattr(info, "vmem_capacity_bytes", cap)
    except Exception:
        pass
    # Half of physical VMEM: 64 MiB on v5e/v6e, 32 MiB on v7x.
    return int(min(cap // 2, 100 * 1024 * 1024))


_VMEM_LIMIT = _vmem_limit_bytes()


def _fit_tile(dim, pref, align):
    """Largest tile <= pref that divides `dim` and is a multiple of `align`;
    falls back to the full dim (always a legal Pallas block extent)."""
    if dim <= pref:
        return dim
    t = (pref // align) * align
    while t >= align:
        if dim % t == 0:
            return t
        t -= align
    return dim


def _fit_tile_parallel(dim, pref, align):
    """Like _fit_tile but keeps >= 2 tiles along a 'parallel' grid axis when
    possible so both v7x TensorCores get work."""
    half = (dim // 2) // align * align
    if half >= align:
        pref = min(pref, half)
    return _fit_tile(dim, pref, align)


def _ffn_tile(hidden_dim):
    """Hidden-dim tile used both for the W1||W2 interleaved weight layout
    (at init) and for the SwiGLU kernel grid (must agree)."""
    return _fit_tile(hidden_dim, 512, 128)


# ----------------------- fused RMSNorm + matmul kernel -----------------------

def _norm_matmul_kernel(x_ref, s_ref, w_ref, o_ref, xn_ref, *, eps):
    # RMSNorm is hoisted: computed once per m tile (n == 0) into bf16 scratch.
    @pl.when(pl.program_id(1) == 0)
    def _():
        x = x_ref[...].astype(jnp.float32)                     # (tm, K)
        var = jnp.mean(x * x, axis=-1, keepdims=True)
        xn_ref[...] = ((x * jax.lax.rsqrt(var + eps)) * s_ref[...]
                       ).astype(jnp.bfloat16)

    o_ref[...] = jnp.dot(xn_ref[...], w_ref[...],
                         preferred_element_type=jnp.float32).astype(o_ref.dtype)


def norm_matmul(x, scale, w, *, eps=1e-6, tm=256, tn=512, out_dtype=jnp.float32):
    """RMSNorm(x) @ w.  x: (M, K) f32, w: (K, N) bf16 -> (M, N) out_dtype."""
    M, K = x.shape
    Kw, N = w.shape
    assert K == Kw
    tm = _fit_tile_parallel(M, tm, 8)
    tn = _fit_tile(N, tn, 128)
    grid = (M // tm, N // tn)
    return pl.pallas_call(
        functools.partial(_norm_matmul_kernel, eps=eps),
        out_shape=jax.ShapeDtypeStruct((M, N), out_dtype),
        grid_spec=pltpu.PrefetchScalarGridSpec(
            num_scalar_prefetch=0,
            grid=grid,
            in_specs=[
                pl.BlockSpec((tm, K), lambda m, n: (m, 0)),
                pl.BlockSpec((1, K), lambda m, n: (0, 0)),
                pl.BlockSpec((K, tn), lambda m, n: (0, n)),
            ],
            out_specs=pl.BlockSpec((tm, tn), lambda m, n: (m, n)),
            scratch_shapes=[pltpu.VMEM((tm, K), jnp.bfloat16)],   # cached norm
        ),
        compiler_params=pltpu.CompilerParams(
            # n must be 'arbitrary': the hoisted-norm scratch is written at
            # n == 0 and reused by the rest of the n loop.
            dimension_semantics=("parallel", "arbitrary"),
            vmem_limit_bytes=_VMEM_LIMIT),
    )(x, scale.reshape(1, K), w)


# ------------------ tiled matmul + fused residual epilogue -------------------

def _matmul_residual_kernel(x_ref, w_ref, r_ref, o_ref, acc_ref):
    @pl.when(pl.program_id(2) == 0)
    def _():
        acc_ref[...] = jnp.zeros_like(acc_ref)

    acc_ref[...] += jnp.dot(x_ref[...].astype(jnp.bfloat16), w_ref[...],
                            preferred_element_type=jnp.float32)

    @pl.when(pl.program_id(2) == pl.num_programs(2) - 1)
    def _():
        o_ref[...] = (acc_ref[...] + r_ref[...].astype(jnp.float32)
                      ).astype(o_ref.dtype)


def matmul_residual(x, w, residual, *, tm=256, tn=512, tk=512):
    """x @ w + residual with K-axis accumulation.  x:(M,K) bf16/f32, w:(K,N) bf16."""
    M, K = x.shape
    Kw, N = w.shape
    assert K == Kw and residual.shape == (M, N)
    tm = _fit_tile_parallel(M, tm, 8)
    tn = _fit_tile(N, tn, 128)
    tk = _fit_tile(K, tk, 128)
    grid = (M // tm, N // tn, K // tk)
    return pl.pallas_call(
        _matmul_residual_kernel,
        out_shape=jax.ShapeDtypeStruct((M, N), jnp.float32),
        grid_spec=pltpu.PrefetchScalarGridSpec(
            num_scalar_prefetch=0,
            grid=grid,
            in_specs=[
                pl.BlockSpec((tm, tk), lambda m, n, k: (m, k)),
                pl.BlockSpec((tk, tn), lambda m, n, k: (k, n)),
                pl.BlockSpec((tm, tn), lambda m, n, k: (m, n)),
            ],
            out_specs=pl.BlockSpec((tm, tn), lambda m, n, k: (m, n)),
            scratch_shapes=[pltpu.VMEM((tm, tn), jnp.float32)],
        ),
        compiler_params=pltpu.CompilerParams(
            dimension_semantics=("parallel", "parallel", "arbitrary"),
            vmem_limit_bytes=_VMEM_LIMIT),
    )(x, w, residual)


# ---------------- fused norm2 + SwiGLU FFN + residual kernel -----------------

def _swiglu_kernel(x_ref, s_ref, w12_ref, w3_ref, o_ref, xn_ref, acc_ref,
                   *, eps, th):
    h_idx = pl.program_id(1)

    @pl.when(h_idx == 0)
    def _():
        x = x_ref[...].astype(jnp.float32)
        var = jnp.mean(x * x, axis=-1, keepdims=True)
        xn_ref[...] = ((x * jax.lax.rsqrt(var + eps)) * s_ref[...]
                       ).astype(jnp.bfloat16)          # cache normed x (bf16)
        acc_ref[...] = jnp.zeros_like(acc_ref)

    # Single fused up-projection: columns [0:th) are W1, [th:2th) are W2.
    h12 = jnp.dot(xn_ref[...], w12_ref[...], preferred_element_type=jnp.float32)
    h1 = h12[:, :th]
    h2 = h12[:, th:]
    g = (h1 * jax.nn.sigmoid(h1)) * h2                  # SiLU(xW1) * xW2, f32
    acc_ref[...] += jnp.dot(g.astype(jnp.bfloat16), w3_ref[...],
                            preferred_element_type=jnp.float32)

    @pl.when(h_idx == pl.num_programs(1) - 1)
    def _():
        # residual add fused (x_ref is the pre-norm shortcut, resident block)
        o_ref[...] = (acc_ref[...] + x_ref[...].astype(jnp.float32)
                      ).astype(o_ref.dtype)


def swiglu_ffn(x, scale, w12, w3, *, eps=1e-6, tm=256):
    """x + W3( SiLU(RMSNorm(x)W1) * RMSNorm(x)W2 ), tiled over the hidden dim.

    w12 is the interleaved fused weight produced by _fuse_w12 (per hidden tile:
    [W1 tile | W2 tile]); w3: (Hf, D) bf16.
    """
    M, D = x.shape
    Hf, Dw = w3.shape
    assert D == Dw
    th = _ffn_tile(Hf)
    assert w12.shape == (D, 2 * Hf)
    tm = _fit_tile_parallel(M, tm, 8)
    grid = (M // tm, Hf // th)
    return pl.pallas_call(
        functools.partial(_swiglu_kernel, eps=eps, th=th),
        out_shape=jax.ShapeDtypeStruct((M, D), jnp.float32),
        grid_spec=pltpu.PrefetchScalarGridSpec(
            num_scalar_prefetch=0,
            grid=grid,
            in_specs=[
                pl.BlockSpec((tm, D), lambda m, h: (m, 0)),
                pl.BlockSpec((1, D), lambda m, h: (0, 0)),
                pl.BlockSpec((D, 2 * th), lambda m, h: (0, h)),
                pl.BlockSpec((th, D), lambda m, h: (h, 0)),
            ],
            out_specs=pl.BlockSpec((tm, D), lambda m, h: (m, 0)),
            scratch_shapes=[pltpu.VMEM((tm, D), jnp.bfloat16),   # normed x
                            pltpu.VMEM((tm, D), jnp.float32)],   # W3 accumulator
        ),
        compiler_params=pltpu.CompilerParams(
            dimension_semantics=("parallel", "arbitrary"),
            vmem_limit_bytes=_VMEM_LIMIT),
    )(x, scale.reshape(1, D), w12, w3)


def _fuse_w12(w1, w2, th):
    """Interleave W1/W2 per hidden tile -> (D, 2*Hf) so the SwiGLU kernel can
    fetch one (D, 2*th) block and issue a single MXU dot per hidden tile."""
    D, Hf = w1.shape
    nh = Hf // th
    stacked = jnp.stack([w1.reshape(D, nh, th), w2.reshape(D, nh, th)], axis=2)
    return stacked.reshape(D, 2 * Hf)


# ---------------- K preprocessing: qk-norm + RoPE, once per layer ------------

def _k_prep_kernel(k_ref, cos_ref, sin_ref, ks_ref, o_ref, *, head_dim, n_kv, eps):
    half = head_dim // 2
    cos = cos_ref[...]
    sin = sin_ref[...]
    k_all = k_ref[0].astype(jnp.float32)                 # (tt, KV*hd)
    for g in range(n_kv):
        sl = slice(g * head_dim, (g + 1) * head_dim)
        kh = k_all[:, sl]
        var = jnp.mean(kh * kh, axis=-1, keepdims=True)
        kh = kh * jax.lax.rsqrt(var + eps) * ks_ref[...]
        kh = kh * cos + pltpu.roll(kh, shift=half, axis=1) * sin
        o_ref[0, :, sl] = kh.astype(o_ref.dtype)


def rope_k(qkv, cos, sin_signed, k_scale, *, n_heads, n_kv_groups, head_dim,
           eps=1e-6, tile_t=256):
    """Apply k-RMSNorm + RoPE once per layer to the K columns of the fused QKV
    activation.  qkv: (B, T, (H+2KV)*hd) bf16 -> (B, T, KV*hd) bf16."""
    B, T, _ = qkv.shape
    H, KV, hd = n_heads, n_kv_groups, head_dim
    gs = H // KV
    tt = _fit_tile(T, tile_t, 8)
    grid = (B, T // tt)
    return pl.pallas_call(
        functools.partial(_k_prep_kernel, head_dim=hd, n_kv=KV, eps=eps),
        out_shape=jax.ShapeDtypeStruct((B, T, KV * hd), jnp.bfloat16),
        grid_spec=pltpu.PrefetchScalarGridSpec(
            num_scalar_prefetch=0,
            grid=grid,
            in_specs=[
                # K columns of qkv start at H*hd == gs * (KV*hd) -> block index gs
                pl.BlockSpec((1, tt, KV * hd), lambda b, t: (b, t, gs)),
                pl.BlockSpec((tt, hd), lambda b, t: (t, 0)),
                pl.BlockSpec((tt, hd), lambda b, t: (t, 0)),
                pl.BlockSpec((1, hd), lambda b, t: (0, 0)),
            ],
            out_specs=pl.BlockSpec((1, tt, KV * hd), lambda b, t: (b, t, 0)),
        ),
        compiler_params=pltpu.CompilerParams(
            dimension_semantics=("parallel", "parallel"),
            vmem_limit_bytes=_VMEM_LIMIT),
    )(qkv, cos, sin_signed, k_scale.reshape(1, hd))


# -------------------- flash-style GQA attention kernel -----------------------

def _attention_kernel(q_ref, k_ref, v_ref, cosq_ref, sinq_ref, qs_ref, o_ref,
                      m_scr, l_scr, acc_scr, q_scr,
                      *, head_dim, group_size, tq, tkv, eps, sm_scale):
    qi = pl.program_id(2)
    ki = pl.program_id(3)
    nk = pl.num_programs(3)
    half = head_dim // 2
    gs = group_size

    @pl.when(ki == 0)
    def _init():
        m_scr[...] = jnp.full_like(m_scr, -jnp.inf)
        l_scr[...] = jnp.zeros_like(l_scr)
        acc_scr[...] = jnp.zeros_like(acc_scr)
        # Prep the group's query heads once per (b, g, qi): qk-norm + RoPE +
        # folded 1/sqrt(hd) scale, stacked head-major along rows.
        q_all = q_ref[0].astype(jnp.float32)               # (tq, gs*hd)
        cos_q = cosq_ref[...]
        sin_q = sinq_ref[...]
        for h in range(gs):
            qh = q_all[:, h * head_dim:(h + 1) * head_dim]
            var = jnp.mean(qh * qh, axis=-1, keepdims=True)
            qh = qh * jax.lax.rsqrt(var + eps) * qs_ref[...]
            qh = (qh * cos_q + pltpu.roll(qh, shift=half, axis=1) * sin_q) * sm_scale
            q_scr[h * tq:(h + 1) * tq, :] = qh.astype(jnp.bfloat16)

    # Causal tile skip (tq == tkv): kv tile ki only contributes if ki <= qi.
    # (For ki > qi the index_map also clamps the block index, so the K/V DMA
    #  is skipped as well.)
    @pl.when(ki <= qi)
    def _compute():
        k_bf = k_ref[0]                                    # (tkv, hd) bf16, roped
        v_bf = v_ref[0]                                    # (tkv, hd) bf16

        # One stacked QK^T for all group_size heads: (gs*tq, tkv)
        s = jax.lax.dot_general(q_scr[...], k_bf, (((1,), (1,)), ((), ())),
                                preferred_element_type=jnp.float32)
        rows = jax.lax.broadcasted_iota(jnp.int32, (gs, tq, tkv), 1
                                        ).reshape(gs * tq, tkv)
        cols = jax.lax.broadcasted_iota(jnp.int32, (gs * tq, tkv), 1)
        masked = (ki * tkv + cols) > (qi * tq + rows)      # in-kernel causal mask
        s = jnp.where(masked, jnp.float32(-1e30), s)

        m_prev = m_scr[...]                                # (gs*tq, 1)
        m_new = jnp.maximum(m_prev, jnp.max(s, axis=-1, keepdims=True))
        alpha = jnp.exp(m_prev - m_new)
        p = jnp.exp(s - m_new)
        l_scr[...] = alpha * l_scr[...] + jnp.sum(p, axis=-1, keepdims=True)
        acc_scr[...] = alpha * acc_scr[...] + jnp.dot(
            p.astype(jnp.bfloat16), v_bf, preferred_element_type=jnp.float32)
        m_scr[...] = m_new

    @pl.when(ki == nk - 1)
    def _finalize():
        inv = pl.reciprocal(l_scr[...], approx=True)       # EUP slot
        out = acc_scr[...] * inv                           # (gs*tq, hd)
        for h in range(gs):
            o_ref[0, :, h * head_dim:(h + 1) * head_dim] = (
                out[h * tq:(h + 1) * tq, :].astype(o_ref.dtype))


def gqa_attention(qkv, k_roped, cos, sin_signed, q_scale, *, n_heads,
                  n_kv_groups, head_dim, eps=1e-6, tile_t=256):
    """Fused GQA attention.  Q/V are read straight from the fused bf16 QKV
    activation; K comes pre-normed/pre-roped (rope_k).  Output (B,T,H*hd) bf16."""
    B, T, _ = qkv.shape
    H, KV, hd = n_heads, n_kv_groups, head_dim
    gs = H // KV
    assert hd % 128 == 0, "TPU kernel assumes head_dim is a multiple of 128"
    tq = _fit_tile(T, tile_t, 8)
    tkv = tq                                       # causal skip assumes tq == tkv
    grid = (B, KV, T // tq, T // tkv)
    kernel = functools.partial(
        _attention_kernel, head_dim=hd, group_size=gs, tq=tq, tkv=tkv,
        eps=eps, sm_scale=1.0 / math.sqrt(hd))

    # Clamp the kv block index for fully-masked tiles so the pipeline skips
    # their K/V DMA (block index unchanged vs. the previous step).
    k_idx = lambda b, g, qi, ki: (b, jnp.minimum(ki, qi), g)
    v_idx = lambda b, g, qi, ki: (b, jnp.minimum(ki, qi), H + KV + g)

    return pl.pallas_call(
        kernel,
        out_shape=jax.ShapeDtypeStruct((B, T, H * hd), jnp.bfloat16),
        grid_spec=pltpu.PrefetchScalarGridSpec(
            num_scalar_prefetch=0,
            grid=grid,
            in_specs=[
                # q: columns [g*gs*hd, (g+1)*gs*hd) of the fused QKV activation
                pl.BlockSpec((1, tq, gs * hd), lambda b, g, qi, ki: (b, qi, g)),
                # k: pre-roped bf16 K tensor, column block g
                pl.BlockSpec((1, tkv, hd), k_idx),
                # v: columns [(H+KV+g)*hd, ...) of the fused QKV activation
                pl.BlockSpec((1, tkv, hd), v_idx),
                pl.BlockSpec((tq, hd), lambda b, g, qi, ki: (qi, 0)),   # cos(q)
                pl.BlockSpec((tq, hd), lambda b, g, qi, ki: (qi, 0)),   # sin(q)
                pl.BlockSpec((1, hd), lambda b, g, qi, ki: (0, 0)),     # q_norm
            ],
            out_specs=pl.BlockSpec((1, tq, gs * hd),
                                   lambda b, g, qi, ki: (b, qi, g)),
            scratch_shapes=[
                pltpu.VMEM((gs * tq, 1), jnp.float32),     # running max m
                pltpu.VMEM((gs * tq, 1), jnp.float32),     # running sum l
                pltpu.VMEM((gs * tq, hd), jnp.float32),    # output accumulator
                pltpu.VMEM((gs * tq, hd), jnp.bfloat16),   # normed+roped q
            ],
        ),
        compiler_params=pltpu.CompilerParams(
            dimension_semantics=("parallel", "parallel", "parallel", "arbitrary"),
            vmem_limit_bytes=_VMEM_LIMIT),
    )(qkv, k_roped, qkv, cos, sin_signed, q_scale.reshape(1, hd))


# ------------------------------ model glue -----------------------------------

def compute_rope_params(head_dim, theta_base, context_length):
    inv_freq = 1.0 / theta_base ** (
        jnp.arange(0, head_dim, 2, dtype=jnp.float32) / head_dim)
    positions = jnp.arange(context_length, dtype=jnp.float32)
    angles = positions[:, None] * inv_freq[None, :]
    angles = jnp.concatenate([angles, angles], axis=1)
    return jnp.cos(angles), jnp.sin(angles)


def init_params(key, cfg):
    D, V = cfg["emb_dim"], cfg["vocab_size"]
    H, KV = cfg["n_heads"], cfg["n_kv_groups"]
    hd, Hf = cfg["head_dim"], cfg["hidden_dim"]
    wdt = jnp.bfloat16  # MXU-native weight storage (halves weight DMA bytes)
    th = _ffn_tile(Hf)
    keys = jax.random.split(key, 3 + cfg["n_layers"])
    params = {
        "tok_emb": jax.random.normal(keys[0], (V, D), jnp.float32) * 0.02,
        "out_head": (jax.random.normal(keys[1], (D, V), jnp.float32) * 0.02
                     ).astype(wdt),
        "final_norm": 1.0 + 0.1 * jax.random.normal(keys[2], (D,), jnp.float32),
        "blocks": [],
    }
    for i in range(cfg["n_layers"]):
        ks = jax.random.split(keys[3 + i], 11)
        wq = jax.random.normal(ks[0], (D, H * hd), jnp.float32) * 0.02
        wk = jax.random.normal(ks[1], (D, KV * hd), jnp.float32) * 0.02
        wv = jax.random.normal(ks[2], (D, KV * hd), jnp.float32) * 0.02
        w1 = jax.random.normal(ks[4], (D, Hf), jnp.float32) * 0.02
        w2 = jax.random.normal(ks[5], (D, Hf), jnp.float32) * 0.02
        blk = {
            "norm1": 1.0 + 0.1 * jax.random.normal(ks[7], (D,), jnp.float32),
            "norm2": 1.0 + 0.1 * jax.random.normal(ks[8], (D,), jnp.float32),
            # fused QKV projection weight (single matmul for q/k/v)
            "Wqkv": jnp.concatenate([wq, wk, wv], axis=1).astype(wdt),
            "Wo": (jax.random.normal(ks[3], (H * hd, D), jnp.float32) * 0.02
                   ).astype(wdt),
            "q_norm": 1.0 + 0.1 * jax.random.normal(ks[9], (hd,), jnp.float32),
            "k_norm": 1.0 + 0.1 * jax.random.normal(ks[10], (hd,), jnp.float32),
            # fused, per-tile-interleaved W1||W2 (one dot per hidden tile)
            "W12": _fuse_w12(w1, w2, th).astype(wdt),
            "W3": (jax.random.normal(ks[6], (Hf, D), jnp.float32) * 0.02
                   ).astype(wdt),
        }
        params["blocks"].append(blk)
    return params


def qwen3_forward(params, in_idx, cfg):
    B, T = in_idx.shape
    D, V = cfg["emb_dim"], cfg["vocab_size"]
    H, KV, hd = cfg["n_heads"], cfg["n_kv_groups"], cfg["head_dim"]
    M = B * T

    x = params["tok_emb"][in_idx].reshape(M, D)          # embedding gather (JAX)

    cos_full, sin_full = compute_rope_params(hd, cfg["rope_base"],
                                             cfg["context_length"])
    cos = cos_full[:T]
    sign = jnp.concatenate([-jnp.ones((hd // 2,), jnp.float32),
                            jnp.ones((hd // 2,), jnp.float32)])
    sin_signed = sin_full[:T] * sign[None, :]            # sign-folded for roll-RoPE

    for blk in params["blocks"]:
        shortcut = x
        # norm1 fused into the fused QKV projection (bf16 activation output)
        qkv = norm_matmul(x, blk["norm1"], blk["Wqkv"], out_dtype=jnp.bfloat16)
        qkv = qkv.reshape(B, T, (H + 2 * KV) * hd)
        # k-RMSNorm + RoPE applied once per layer (not per q tile)
        k_roped = rope_k(qkv, cos, sin_signed, blk["k_norm"],
                         n_heads=H, n_kv_groups=KV, head_dim=hd)
        # flash-style GQA attention (q-norm + RoPE + causal softmax fused)
        ctx = gqa_attention(qkv, k_roped, cos, sin_signed, blk["q_norm"],
                            n_heads=H, n_kv_groups=KV, head_dim=hd)
        # out-projection with residual add fused into the epilogue
        x = matmul_residual(ctx.reshape(M, H * hd), blk["Wo"], shortcut)
        # norm2 + SwiGLU + residual, fully fused, tiled over the hidden dim
        x = swiglu_ffn(x, blk["norm2"], blk["W12"], blk["W3"])

    # final_norm fused into the LM head; vocab axis tiled lane-dense
    logits = norm_matmul(x, params["final_norm"], params["out_head"],
                         tm=512, tn=512)
    return logits.reshape(B, T, V)
    # TODO(synk): KV-cache decode path (cache dict, start_pos offsets) not implemented.


# --------------------------- pure-JAX reference ------------------------------

def _rms_ref(x, scale, eps=1e-6):
    x = x.astype(jnp.float32)
    var = jnp.mean(x * x, axis=-1, keepdims=True)
    return x * jax.lax.rsqrt(var + eps) * scale


def _rope_ref(x, cos, sin):
    hd = x.shape[-1]
    half = hd // 2
    x1, x2 = x[..., :half], x[..., half:]
    rot = jnp.concatenate([-x2, x1], axis=-1)
    return x * cos[None, None] + rot * sin[None, None]


def _unfuse_w12(w12, Hf, th):
    D = w12.shape[0]
    nh = Hf // th
    w = w12.reshape(D, nh, 2, th)
    return w[:, :, 0, :].reshape(D, Hf), w[:, :, 1, :].reshape(D, Hf)


def reference_forward(params, in_idx, cfg):
    B, T = in_idx.shape
    H, KV, hd = cfg["n_heads"], cfg["n_kv_groups"], cfg["head_dim"]
    Hf = cfg["hidden_dim"]
    th = _ffn_tile(Hf)
    gs = H // KV
    x = params["tok_emb"][in_idx]
    cos_full, sin_full = compute_rope_params(hd, cfg["rope_base"],
                                             cfg["context_length"])
    cos, sin = cos_full[:T], sin_full[:T]
    mask = jnp.triu(jnp.ones((T, T), jnp.bool_), k=1)

    for blk in params["blocks"]:
        h = _rms_ref(x, blk["norm1"])
        Wqkv = blk["Wqkv"].astype(jnp.float32)
        Wq = Wqkv[:, :H * hd]
        Wk = Wqkv[:, H * hd:(H + KV) * hd]
        Wv = Wqkv[:, (H + KV) * hd:]
        q = (h @ Wq).reshape(B, T, H, hd).transpose(0, 2, 1, 3)
        k = (h @ Wk).reshape(B, T, KV, hd).transpose(0, 2, 1, 3)
        v = (h @ Wv).reshape(B, T, KV, hd).transpose(0, 2, 1, 3)
        q = _rope_ref(_rms_ref(q, blk["q_norm"]), cos, sin)
        k = _rope_ref(_rms_ref(k, blk["k_norm"]), cos, sin)
        k = jnp.repeat(k, gs, axis=1)
        v = jnp.repeat(v, gs, axis=1)
        scores = jnp.einsum("bhqd,bhkd->bhqk", q, k)
        scores = jnp.where(mask[None, None], -jnp.inf, scores)
        w = jax.nn.softmax(scores / jnp.sqrt(jnp.float32(hd)), axis=-1)
        ctx = jnp.einsum("bhqk,bhkd->bhqd", w, v).transpose(0, 2, 1, 3)
        x = ctx.reshape(B, T, H * hd) @ blk["Wo"].astype(jnp.float32) + x
        h = _rms_ref(x, blk["norm2"])
        W1, W2 = _unfuse_w12(blk["W12"].astype(jnp.float32), Hf, th)
        x = (jax.nn.silu(h @ W1) * (h @ W2)) @ blk["W3"].astype(jnp.float32) + x

    x = _rms_ref(x, params["final_norm"])
    return x @ params["out_head"].astype(jnp.float32)


# ---------------------------------- main --------------------------------------

if __name__ == "__main__":
    cfg = dict(
        vocab_size=512,
        context_length=128,
        emb_dim=256,
        n_heads=4,
        n_kv_groups=2,
        head_dim=128,      # real Qwen3 head_dim; keeps all blocks lane aligned
        hidden_dim=512,
        n_layers=2,
        qk_norm=True,
        rope_base=10000.0,
    )
    key = jax.random.PRNGKey(0)
    pkey, ikey = jax.random.split(key)
    params = init_params(pkey, cfg)

    B, T = 2, 64
    in_idx = jax.random.randint(ikey, (B, T), 0, cfg["vocab_size"])

    logits = jax.block_until_ready(qwen3_forward(params, in_idx, cfg))
    assert logits.shape == (B, T, cfg["vocab_size"])

    ref = jax.block_until_ready(reference_forward(params, in_idx, cfg))
    # bf16 MXU inputs + bf16 qkv/ctx/K activations vs the f32 reference
    # -> slightly looser tolerance than the pure-f32-activation variant.
    np.testing.assert_allclose(np.asarray(logits), np.asarray(ref),
                               rtol=3e-2, atol=3e-2)
    print("KERNEL_OK")
</pallas_src>

<mosaic_0001>
module attributes {stable_mosaic.version = 11 : i64} {
  func.func @_norm_matmul_kernel(%arg0: i32, %arg1: i32, %arg2: memref<64x256xf32, #tpu.memory_space<vmem>>, %arg3: memref<1x256xf32, #tpu.memory_space<vmem>>, %arg4: memref<256x512xbf16, #tpu.memory_space<vmem>>, %arg5: memref<64x512xbf16, #tpu.memory_space<vmem>>, %arg6: memref<64x256xbf16, #tpu.memory_space<vmem>>) attributes {dimension_semantics = [#tpu.dimension_semantics<parallel>, #tpu.dimension_semantics<arbitrary>], iteration_bounds = array<i64: 2, 2>, scalar_prefetch = 0 : i64, scratch_operands = 1 : i64, tpu.core_type = #tpu.core_type<tc>, window_params = [{transform_indices = @transform_0, window_bounds = array<i64: 64, 256>}, {pipeline_mode = #tpu.pipeline_mode<synchronous>, transform_indices = @transform_1, window_bounds = array<i64: 1, 256>}, {transform_indices = @transform_2, window_bounds = array<i64: 256, 512>}, {transform_indices = @transform_3, window_bounds = array<i64: 64, 512>}]} {
    %c0_i32 = arith.constant 0 : i32
    %0 = arith.cmpi eq, %arg1, %c0_i32 : i32
    %1 = arith.extui %0 : i1 to i32
    %c0_i32_0 = arith.constant 0 : i32
    %2 = arith.cmpi ne, %1, %c0_i32_0 : i32
    scf.if %2 {
      %c0_6 = arith.constant 0 : index
      %c0_7 = arith.constant 0 : index
      %8 = vector.load %arg2[%c0_6, %c0_7] : memref<64x256xf32, #tpu.memory_space<vmem>>, vector<64x256xf32>
      %9 = arith.mulf %8, %8 : vector<64x256xf32>
      %cst_8 = arith.constant dense<0.000000e+00> : vector<64xf32>
      %10 = vector.multi_reduction <add>, %9, %cst_8 [1] : vector<64x256xf32> to vector<64xf32>
      %11 = vector.shape_cast %10 : vector<64xf32> to vector<64x1xf32>
      %cst_9 = arith.constant 2.560000e+02 : f32
      %12 = vector.broadcast %cst_9 : f32 to vector<64x1xf32>
      %13 = arith.divf %11, %12 : vector<64x1xf32>
      %cst_10 = arith.constant 9.99999997E-7 : f32
      %14 = vector.broadcast %cst_10 : f32 to vector<64x1xf32>
      %15 = arith.addf %13, %14 : vector<64x1xf32>
      %16 = math.rsqrt %15 : vector<64x1xf32>
      %17 = vector.broadcast %16 : vector<64x1xf32> to vector<64x256xf32>
      %18 = arith.mulf %8, %17 : vector<64x256xf32>
      %c0_11 = arith.constant 0 : index
      %c0_12 = arith.constant 0 : index
      %19 = vector.load %arg3[%c0_11, %c0_12] : memref<1x256xf32, #tpu.memory_space<vmem>>, vector<1x256xf32>
      %20 = vector.broadcast %19 : vector<1x256xf32> to vector<64x256xf32>
      %21 = arith.mulf %18, %20 : vector<64x256xf32>
      %22 = arith.truncf %21 : vector<64x256xf32> to vector<64x256xbf16>
      %c0_13 = arith.constant 0 : index
      %c0_14 = arith.constant 0 : index
      %23 = vector.load %arg6[%c0_13, %c0_14] : memref<64x256xbf16, #tpu.memory_space<vmem>>, vector<64x256xbf16>
      tpu.vector_store %arg6[%c0_13, %c0_14], %22 {strides = array<i32>} : memref<64x256xbf16, #tpu.memory_space<vmem>>, vector<64x256xbf16>,
    } else {
    }
    %c0 = arith.constant 0 : index
    %c0_1 = arith.constant 0 : index
    %3 = vector.load %arg6[%c0, %c0_1] : memref<64x256xbf16, #tpu.memory_space<vmem>>, vector<64x256xbf16>
    %c0_2 = arith.constant 0 : index
    %c0_3 = arith.constant 0 : index
    %4 = vector.load %arg4[%c0_2, %c0_3] : memref<256x512xbf16, #tpu.memory_space<vmem>>, vector<256x512xbf16>
    %cst = arith.constant dense<0.000000e+00> : vector<64x512xf32>
    %5 = tpu.matmul %3, %4, %cst {dimension_numbers = #tpu.dot_dimension_numbers<[1], [0], [0], [1], [0, 0, 1, 1], [], []>} : vector<64x256xbf16>, vector<256x512xbf16>, vector<64x512xf32> -> vector<64x512xf32>
    %6 = arith.truncf %5 : vector<64x512xf32> to vector<64x512xbf16>
    %c0_4 = arith.constant 0 : index
    %c0_5 = arith.constant 0 : index
    %7 = vector.load %arg5[%c0_4, %c0_5] : memref<64x512xbf16, #tpu.memory_space<vmem>>, vector<64x512xbf16>
    tpu.vector_store %arg5[%c0_4, %c0_5], %6 {strides = array<i32>} : memref<64x512xbf16, #tpu.memory_space<vmem>>, vector<64x512xbf16>,
    return
  }
  func.func @transform_0(%arg0: i32, %arg1: i32) -> (i32, i32) {
    %c0_i32 = arith.constant 0 : i32
    %c0_i32_0 = arith.constant 0 : i32
    return %arg0, %c0_i32 : i32, i32
  }
  func.func @transform_1(%arg0: i32, %arg1: i32) -> (i32, i32) {
    %c0_i32 = arith.constant 0 : i32
    %c0_i32_0 = arith.constant 0 : i32
    %c0_i32_1 = arith.constant 0 : i32
    return %c0_i32, %c0_i32_0 : i32, i32
  }
  func.func @transform_2(%arg0: i32, %arg1: i32) -> (i32, i32) {
    %c0_i32 = arith.constant 0 : i32
    %c0_i32_0 = arith.constant 0 : i32
    return %c0_i32, %arg1 : i32, i32
  }
  func.func @transform_3(%arg0: i32, %arg1: i32) -> (i32, i32) {
    %c0_i32 = arith.constant 0 : i32
    return %arg0, %arg1 : i32, i32
  }
}

</mosaic_0001>

<bundles_post_ra>
// kernel: tpu_custom_call.1
= control target key start
LH: loop header
LB: loop body
LE: loop exit
PB: predicated region body
PF: predicated region fallthrough
CT: control target
= control target key end

     0   :  { %s2418_s0 = inlined_call_operand.hbm [shape: f32[128,256], index: 0, kind: input, shape index: {}]   ;;  %s2419_s1 = inlined_call_operand.hbm [shape: f32[1,256], index: 1, kind: input, shape index: {}]   ;;  %s2420_s2 = inlined_call_operand.hbm [shape: bf16[256,1024], index: 2, kind: input, shape index: {}]   ;;  %s2421_s3 = inlined_call_operand.hbm [shape: bf16[128,1024], index: 3, kind: output, shape index: {}]  }
   0x1   :  { %2439 = sst [smem:[#allocation25_spill]] %s2418_s0 }
   0x2   :  { %2440 = sst [smem:[#allocation26_spill]] %s2421_s3 }
   0x3   :  { %8 = vsyncpa [#allocation4], 0 }
   0x4   :  { %10 = vsyncpa [#allocation4 + $0x1], 0 }
   0x5   :  { %11 = vsyncpa [#allocation7], 0 }
   0x6   :  { %12 = vsyncpa [#allocation5], 0 }
   0x7   :  { %14 = vsyncpa [#allocation5 + $0x1], 0  ;;  %s1846_s12 = smov 0   ;;  %s1848_s13 = smov 0  }
   0x8   :  { %s1850_s14 = smov 0   ;;  %s1852_s15 = smov 0  }
   0x9   :  { %s1854_s16 = smov 0   ;;  %s1856_s17 = smov 0  }
   0xa   :  { %s1858_s18 = smov 0   ;;  %s1860_s19 = smov 0  }
   0xb   :  { %s1862_s20 = smov 0   ;;  %s1864_s21 = smov 0  }
   0xc   :  { %s1866_s22 = smov 0   ;;  %s1868_s23 = smov 0  }
   0xd   :  { %s1870_s24 = smov 0   ;;  %s1872_s25 = smov 0  }
   0xe LB: > { %2441 = sst [smem:[#allocation14_spill]] %s1782_s17  ;;  %s29_s26 = sadd.s32 1, %s1806_s23  ;;  %s1814_s25 = sphi %s1872_s25, %s20_s25   ;;  %s1810_s24 = sphi %s1870_s24, %s2502_s24   ;;  %s1806_s23 = sphi %s1868_s23, %s2501_s23   ;;  %s1802_s22 = sphi %s1866_s22, %s2489_s22   ;;  %s1798_s21 = sphi %s1864_s21, %s2488_s21   ;;  %s1794_s20 = sphi %s1862_s20, %s2500_s20   ;;  %s1790_s19 = sphi %s1860_s19, %s2499_s19   ;;  %s1786_s18 = sphi %s1858_s18, %s2498_s18   ;;  %s1782_s17 = sphi %s1856_s17, %s2485_s17   ;;  %s1778_s16 = sphi %s1854_s16, %s2497_s16   ;;  %s1774_s15 = sphi %s1852_s15, %s2496_s15   ;;  %s1770_s14 = sphi %s1850_s14, %s2495_s14   ;;  %s1766_s13 = sphi %s1848_s13, %s2494_s13   ;;  %s1762_s12 = sphi %s1846_s12, %s2493_s12  }
   0xf   : > { %2442 = sst [smem:[#allocation15_spill]] %s1794_s20  ;;  %s32_s27 = sadd.s32 1, %s1810_s24 }
  0x10   : > { %2443 = sst [smem:[#allocation16_spill]] %s1798_s21  ;;  %p30_p0 = scmp.ge.s32.totalorder %s29_s26, 2 }
  0x11   : > { %2444 = sst [smem:[#allocation17_spill]] %s1802_s22  ;;  %s39_s28 = sadd.s32 1, %s1794_s20 }
  0x12   : > { %2445 = sst [smem:[#allocation18_spill]] %s1806_s23  ;;  %p46_p1 = scmp.ne.s32.totalorder %s1794_s20, %s1790_s19 }
  0x13   : > { %2446 = sst [smem:[#allocation19_spill]] %s1810_s24  ;;  %p2426_p2 = scmp.eq.s32.totalorder %s1814_s25, 0 }
  0x14   : > { %s2504_s26 = smov (%p30_p0, %s29_s26), 0  ;;  %s2506_s27 = smov (!%p30_p0, %s32_s27), %s1810_s24 }
  0x15   : > { %2447 = sst [smem:[#allocation20_spill]] %s2504_s26  ;;  %p1927_p3 = por %p2426_p2, %p46_p1 }
  0x16   : > { %s1933_s30 = ssub.s32 %s1806_s23, %s2504_s26  ;;  %p34_p4 = scmp.ge.s32.totalorder %s2506_s27, 2 }
  0x17   : > { %p2425_p6 = scmp.lt.s32.totalorder %s1814_s25, 4  ;;  %s162_s4 = sand.u32 1, %s1814_s25  }
  0x18   : > { %s2508_s27 = smov (%p34_p4, %s2506_s27), 0  ;;  %s164_s5 = sand.u32 1, %s1794_s20  }
  0x19   : > { %2449 = sst [smem:[#allocation21_spill]] %s2508_s27  ;;  %s36_s6 = ssub.s32 %s1810_s24, %s2508_s27 }
  0x1a   : > { %p37_p7 = scmp.eq.s32.totalorder %s36_s6, 0  ;;  %s111_s7 = sor.u32 %s1933_s30, %s36_s6 }
  0x1b   : > { %p1944_p8 = scmp.eq.s32.totalorder %s111_s7, 0  ;;  %s1192_s9 = sshll.u32 %s164_s5, 7 }
  0x1c   : > { %s1949_s10 = scalar_select %p37_p7, %s1794_s20, %s39_s28  }
  0x1d   : > { %s1293_s11 = sshll.u32 %s1810_s24, 11  ;;  %s2452_s0 = sld [smem:[#allocation25_spill]] }
  0x1e   : > { %2451 = sst [smem:[#allocation22_spill]] %s1949_s10  ;;  %s166_s27 = scalar_lea.vmem [#allocation3], %s1192_s9 }
  0x1f   : > { %s174_s21 = sshll.u32 %s166_s27, 4  ;;  %p1963_p9 = pnand %p2425_p6, %p1927_p3  ;;  %s1957_s21 = int_to_ptr.vmem [resolvable:$true] %s174_s21 }
  0x20   : > { %s1967_s28 = scalar_lea.sflag [#allocation4], %s162_s4 }
  0x21   : > { %p1574_p11 = pneg %p1963_p9 }
  0x23   : > { %s1955_s22 = scalar_lea.hbm %s2452_s0, %s1293_s11  ;;  %s1577_s29 = scalar_lea.hbm %s2452_s0, 4096 }
  0x24   : > { %s1572_s3 = scalar_lea.hbm %s1955_s22, 2048  ;;  %p1578_p0 = scmp.lt.u32.totalorder %s1955_s22, %s2452_s0 }
  0x25   : > { %p1573_p10 = scmp.ne.s32.totalorder %s1955_s22, %s1572_s3  ;;  %p1579_p1 = scmp.lt.u32.totalorder %s1577_s29, %s1572_s3 }
  0x26   : > { %p1581_p4 = scmp.lt.u32.totalorder %s1572_s3, %s1955_s22 }
  0x27   : > { %p1575_p12 = pnand %p1574_p11, %p1573_p10  ;;  %p1580_p3 = por %p1579_p1, %p1578_p0 }
  0x29   : > { %p1576_p13 = pneg %p1575_p12  ;;  %p1582_p7 = por %p1581_p4, %p1580_p3 }
  0x2b   : > { %p1583_p6 = pnand %p1582_p7, %p1576_p13 }
  0x2d   : > { %1586 = shalt.err (!%p1583_p6)
}
  0x2e   : > { %s1587_s4 = scalar_lea.vmem %s1957_s21, 2048  ;;  %s1816_s9 = smov [#allocation3]  }
  0x2f   : > { %p1588_p10 = scmp.ne.s32.totalorder %s1957_s21, %s1587_s4  ;;  %s1592_s11 = sshll.u32 %s1816_s9, 4  ;;  %s1593_s11 = int_to_ptr.vmem [resolvable:$false] %s1592_s11 }
  0x30   : > { %s1594_s26 = scalar_lea.vmem %s1593_s11, 4096  ;;  %p1595_p5 = scmp.lt.s32.totalorder %s1957_s21, %s1593_s11 }
  0x31   : > { %p1590_p12 = pnand %p1588_p10, %p1574_p11  ;;  %p1596_p0 = scmp.lt.s32.totalorder %s1594_s26, %s1587_s4 }
  0x33   : > { %p1591_p2 = pneg %p1590_p12  ;;  %p1597_p1 = por %p1596_p0, %p1595_p5 }
  0x35   : > { %p1598_p3 = pnand %p1597_p1, %p1591_p2 }
  0x37   : > { %1601 = shalt.err (!%p1598_p3)
}
  0x38   : > { %s2427_s3 = smov 256   ;;  %s2428_s27 = smov 16  }
  0x39   : > { %1329 = dma.hbm_to_vmem [thread:$0]  (!%p1963_p9), %s1955_s22, 2048, %s1957_s21, %s1967_s28, %s2427_s3, %s2427_s3, %s2428_s27  }
  0x3a   : > { %s1999_s29 = sadd.s32 4294967295, %s1814_s25   ;;  %s1188_s6 = sadd.s32 4294967294, %s1814_s25  }
  0x3b   : > { %p52_p2 = scmp.ne.s32.totalorder %s1790_s19, %s1786_s18  ;;  %p2433_p5 = scmp.eq.s32.totalorder %s1999_s29, 0 }
  0x3c   : > { %s86_s5 = sadd.s32 1, %s1782_s17  ;;  %p2454_p6 = scmp.eq.s32.totalorder %s1933_s30, 0 }
  0x3d   : > { %p2013_p11 = por %p2433_p5, %p52_p2  ;;  %p93_p9 = scmp.ne.s32.totalorder %s1782_s17, %s1778_s16 }
  0x3e   : > { %s2009_s7 = scalar_select %p2454_p6, %s1782_s17, %s86_s5  }
  0x3f   : > { %s2456_s21 = scalar_select %p2013_p11, 1, 0 }
  0x40   : > { %2455 = sst [smem:[#allocation23_spill]] %s2009_s7  ;;  %p99_p13 = scmp.ne.s32.totalorder %s1778_s16, %s1774_s15 }
  0x41   : > { %s114_s22 = sadd.s32 1, %s1770_s14  ;;  %p2457_p4 = scmp.eq.s32.totalorder %s1814_s25, 0 }
  0x42   : > { %p124_p10 = scmp.ne.s32.totalorder %s1770_s14, %s1766_s13  ;;  %p2032_p12 = por %p99_p13, %p2433_p5 }
  0x43   : > { %p2024_p7 = por %p93_p9, %p2457_p4  ;;  %p125_p0 = scmp.eq.s32.totalorder %s1999_s29, 3 }
  0x44   : > { %s2459_s18 = scalar_select %p2032_p12, 1, 0 }
  0x45   : > { %s2040_s30 = scalar_select %p1944_p8, %s1770_s14, %s114_s22  }
  0x46   : > { %p2042_p1 = por %p125_p0, %p124_p10  ;;  %p130_p3 = scmp.ne.s32.totalorder %s1766_s13, %s1762_s12 }
  0x47   : > { %2460 = sst [smem:[#allocation24_spill]] %s2040_s30  ;;  %p131_p2 = scmp.eq.s32.totalorder %s1188_s6, 3 }
  0x48   : > { %s2461_s15 = scalar_select %p2042_p1, 1, 0 }
  0x49   : > { %p1189_p6 = scmp.ge.s32.totalorder %s1814_s25, 1  ;;  %p138_p9 = scmp.lt.s32.totalorder %s1814_s25, 5 }
  0x4a   : > { %p2050_p4 = por %p131_p2, %p130_p3  ;;  %s1819_s8 = smov [#allocation6]  }
  0x4b   : > { %p2054_p13 = pnand %p1189_p6, %p138_p9  ;;  %s151_s26 = sshll.u32 %s1819_s8, 4  ;;  %s152_s26 = int_to_ptr.vmem [resolvable:$true] %s151_s26 }
  0x4c   : > { %s2462_s9 = scalar_select %p2050_p4, 1, 0 }
  0x4d   : > { %s2463_s11 = scalar_select %p2054_p13, 1, 0 }
  0x4e   : > { %p2464_p8 = scmp.lt.s32.totalorder %s1814_s25, 4  ;;  %p1322_p0 = pneg %p2054_p13 }
  0x4f   : > { %s186_s6 = sand.u32 1, %s1782_s17   ;;  %s1294_s27 = sshll.u32 %s1806_s23, 8 }
  0x50   : > { %p2062_p10 = pnand %p2464_p8, %p2024_p7  ;;  %s1196_s22 = sshll.u32 %s186_s6, 9 }
  0x51   : > { %p2071_p3 = pnand %p1322_p0, %p2433_p5  ;;  %s188_s0 = scalar_lea.vmem [#allocation8], %s1196_s22 }
  0x52   : > { %s2465_s5 = scalar_select %p2062_p10, 1, 0 }
  0x53   : > { %s195_s8 = sshll.u32 %s188_s0, 4  ;;  %s2079_s10 = scalar_lea.hbm %s2420_s2, %s1294_s27  ;;  %s2097_s8 = int_to_ptr.vmem [resolvable:$true] %s195_s8 }
  0x54   : > { %s1602_s30 = scalar_lea.hbm %s2419_s1, 32  ;;  %p1604_p2 = pneg %p2071_p3 }
  0x55   : > { %p1603_p7 = scmp.ne.s32.totalorder %s2419_s1, %s1602_s30  ;;  %p1609_p8 = scmp.lt.u32.totalorder %s1602_s30, %s2419_s1 }
  0x57   : > { %p1605_p6 = pnand %p1604_p2, %p1603_p7 }
  0x59   : > { %p1606_p9 = pneg %p1605_p6 }
  0x5b   : > { %p1611_p0 = pnand %p1609_p8, %p1606_p9 }
  0x5d   : > { %1614 = shalt.err (!%p1611_p0)
}
  0x5e   : > { %s1615_s0 = scalar_lea.vmem %s152_s26, 32  ;;  %p1623_p12 = scmp.lt.s32.totalorder %s152_s26, %s152_s26 }
  0x5f   : > { %p1616_p5 = scmp.ne.s32.totalorder %s152_s26, %s1615_s0  ;;  %p1624_p11 = scmp.lt.s32.totalorder %s1615_s0, %s1615_s0 }
  0x61   : > { %p1618_p4 = pnand %p1616_p5, %p1604_p2  ;;  %p1625_p13 = por %p1624_p11, %p1623_p12 }
  0x63   : > { %p1619_p1 = pneg %p1618_p4 }
  0x65   : > { %p1626_p10 = pnand %p1625_p13, %p1619_p1 }
  0x67   : > { %1629 = shalt.err (!%p1626_p10)
}
  0x68   : > { %1325 = dma.hbm_to_vmem [thread:$0]  (!%p2071_p3), %s2419_s1, 32, %s152_s26, [#allocation7]  }
  0x69   : > { %s1630_s23 = scalar_lea.hbm %s2079_s10, 8192  ;;  %p2467_p4 = scmp.ne.s32.totalorder %s2465_s5, 0 }
  0x6a   : > { %p1631_p5 = scmp.ne.s32.totalorder %s2079_s10, %s1630_s23  ;;  %s1635_s27 = scalar_lea.hbm %s2420_s2, 16384 }
  0x6b   : > { %p1632_p11 = pneg %p2467_p4  ;;  %p1636_p13 = scmp.lt.u32.totalorder %s2079_s10, %s2420_s2 }
  0x6c   : > { %p1637_p10 = scmp.lt.u32.totalorder %s1635_s27, %s1630_s23  ;;  %p1639_p7 = scmp.lt.u32.totalorder %s1630_s23, %s2079_s10 }
  0x6d   : > { %p1633_p12 = pnand %p1632_p11, %p1631_p5 }
  0x6e   : > { %p1638_p3 = por %p1637_p10, %p1636_p13 }
  0x6f   : > { %p1634_p1 = pneg %p1633_p12 }
  0x70   : > { %p1640_p2 = por %p1639_p7, %p1638_p3 }
  0x72   : > { %p1641_p6 = pnand %p1640_p2, %p1634_p1 }
  0x74   : > { %1644 = shalt.err (!%p1641_p6)
}
  0x75   : > { %s1645_s26 = scalar_lea.vmem %s2097_s8, 8192  ;;  %s1820_s4 = smov [#allocation8]  }
  0x76   : > { %p1646_p9 = scmp.ne.s32.totalorder %s2097_s8, %s1645_s26  ;;  %s1650_s6 = sshll.u32 %s1820_s4, 4  ;;  %s1651_s6 = int_to_ptr.vmem [resolvable:$false] %s1650_s6 }
  0x77   : > { %s1652_s22 = scalar_lea.vmem %s1651_s6, 16384  ;;  %p1653_p5 = scmp.lt.s32.totalorder %s2097_s8, %s1651_s6 }
  0x78   : > { %p1648_p8 = pnand %p1646_p9, %p1632_p11  ;;  %p1654_p12 = scmp.lt.s32.totalorder %s1652_s22, %s1645_s26 }
  0x7a   : > { %p1649_p0 = pneg %p1648_p8  ;;  %p1655_p13 = por %p1654_p12, %p1653_p5 }
  0x7c   : > { %p1656_p10 = pnand %p1655_p13, %p1649_p0 }
  0x7e   : > { %1659 = shalt.err (!%p1656_p10)
}
  0x7f   : > { %s1821_s0 = smov 512   ;;  %s2468_s17 = smov 16  }
  0x80   : > { %s2469_s20 = smov 256   ;;  %p2470_p11 = scmp.ne.s32.totalorder %s2463_s11, 0 }
  0x81   : > { %1332 = dma.hbm_to_vmem [thread:$0]  (!%p2467_p4), %s2079_s10, 8192, %s2097_s8, %s1967_s28, %s1821_s0, %s2469_s20, %s2468_s17  }
  0x82   : > { %207 = sbr.rel (%p2470_p11) target bundleno = 656 (0x290), region = 32  ;;  %s209_s23 = sand.u32 (!%p2470_p11), 1, %s1999_s29  }
  0x83   : > { %s211_s24 = sand.u32 (!%p2470_p11), 1, %s1790_s19   ;;  %s210_s27 = scalar_lea.sflag (!%p2470_p11), [#allocation4], %s209_s23 }
  0x84   : > { %s1200_s3 = sshll.u32 (!%p2470_p11), %s211_s24, 7  ;;  %p2471_p1 = scmp.ne.s32.totalorder (!%p2470_p11), %s2456_s21, 0 }
  0x85   : > { %s2131_s7 = scalar_lea.vmem (!%p2470_p11), [#allocation3], %s1200_s3 }
  0x89   : > { %1745 = dma.done.wait (%p2471_p1), %s210_s27, 2048  }
  0x8a   : > { %1747 = vsyncadd (%p2471_p1), %s210_s27, 4294965248  ;;  %p2472_p3 = scmp.eq.s32.totalorder %s1999_s29, 0 }
  0x8c   : > { %1749 = dma.done.wait (%p2472_p3), [#allocation7], 32   ;;  %p2473_p4 = pmov %p2472_p3 }
  0x8d   : > { %s224_s10 = sand.u32 1, %s1778_s16   ;;  %p2474_p7 = scmp.ne.s32.totalorder %s2459_s18, 0 }
  0x8e   : > { %1751 = vsyncadd (%p2473_p4), [#allocation7], 4294967264  ;;  %s1202_s28 = sshll.u32 %s224_s10, 9 }
  0x8f   : > { %s2142_s11 = scalar_lea.vmem [#allocation8], %s1202_s28 }
  0x90   : > { %1753 = dma.done.wait (%p2474_p7), %s210_s27, 8192  }
  0x91   : > { %1755 = vsyncadd (%p2474_p7), %s210_s27, 4294959104  ;;  %s251_s21 = sand.u32 1, %s1766_s13   ;;  %s2475_s29 = sld [smem:[#allocation16_spill]] }
  0x92   : > { %s1203_s5 = sshll.u32 %s251_s21, 7 }
  0x93   : > { %s2151_s8 = scalar_lea.vmem [#allocation9], %s1203_s5 }
  0x97   : > { %p1204_p2 = scmp.ne.s32.totalorder %s2475_s29, 0 }
  0x98   : > { %v2155_v0 = vld [vmem:[%s2131_s7 + $0x20] sm:$0xff] (!%p1204_p2)  ;;  %v2158_v1 = vld [vmem:[%s2131_s7 + $0x28] sm:$0xff] (!%p1204_p2)  ;;  %v2173_v7 = vld [vmem:[%s2131_s7 + $0x30] sm:$0xff] (!%p1204_p2)  ;;  %v361_v47 = vlaneseq (!%p1204_p2) }
  0x99   : > { %261 = sbr.rel (%p1204_p2) target bundleno = 334 (0x14e), region = 48  ;;  %v2161_v2 = vld [vmem:[%s2131_s7] sm:$0xff] (!%p1204_p2)  ;;  %v282_v3 = vmul.f32 (!%p1204_p2), %v2155_v0, %v2155_v0  ;;  %v283_v4 = vmul.f32 (!%p1204_p2), %v2158_v1, %v2158_v1  ;;  %v2168_v5 = vld [vmem:[%s2131_s7 + $0x8] sm:$0xff] (!%p1204_p2)  ;;  %v2176_v8 = vld [vmem:[%s2131_s7 + $0x38] sm:$0xff] (!%p1204_p2)  ;;  %v284_v10 = vmul.f32 (!%p1204_p2), %v2173_v7, %v2173_v7 }
  0x9a   : > { %v278_v6 = vmul.f32 (!%p1204_p2), %v2161_v2, %v2161_v2  ;;  %v279_v9 = vmul.f32 (!%p1204_p2), %v2168_v5, %v2168_v5  ;;  %v285_v11 = vmul.f32 (!%p1204_p2), %v2176_v8, %v2176_v8  ;;  %v2185_v12 = vld [vmem:[%s2131_s7 + $0x10] sm:$0xff] (!%p1204_p2)  ;;  %v2188_v13 = vld [vmem:[%s2131_s7 + $0x18] sm:$0xff] (!%p1204_p2)  ;;  %v2201_v19 = vld [vmem:[%s2131_s7 + $0x40] sm:$0xff] (!%p1204_p2)  ;;  %v362_v54 = vshrl.u32 (!%p1204_p2), %v361_v47, 7 }
  0x9b   : > { %v2191_v14 = vld [vmem:[%s2131_s7 + $0x50] sm:$0xff] (!%p1204_p2)  ;;  %v300_v15 = vadd.f32 (!%p1204_p2), %v283_v4, %v282_v3  ;;  %v280_v16 = vmul.f32 (!%p1204_p2), %v2185_v12, %v2185_v12  ;;  %v281_v17 = vmul.f32 (!%p1204_p2), %v2188_v13, %v2188_v13  ;;  %v2198_v18 = vld [vmem:[%s2131_s7 + $0x58] sm:$0xff] (!%p1204_p2)  ;;  %v2204_v20 = vld [vmem:[%s2131_s7 + $0x48] sm:$0xff] (!%p1204_p2)  ;;  %v286_v26 = vmul.f32 (!%p1204_p2), %v2201_v19, %v2201_v19 }
  0x9c   : > { %v294_v21 = vadd.f32 (!%p1204_p2), %v279_v9, %v278_v6  ;;  %v303_v22 = vadd.f32 (!%p1204_p2), %v285_v11, %v284_v10  ;;  %v288_v23 = vmul.f32 (!%p1204_p2), %v2191_v14, %v2191_v14  ;;  %v289_v24 = vmul.f32 (!%p1204_p2), %v2198_v18, %v2198_v18  ;;  %v2215_v28 = vld [vmem:[%s2131_s7 + $0x70] sm:$0xff] (!%p1204_p2)  ;;  %v2218_v29 = vld [vmem:[%s2131_s7 + $0x78] sm:$0xff] (!%p1204_p2)  ;;  %v2221_v30 = vld [vmem:[%s2131_s7 + $0x60] sm:$0xff] (!%p1204_p2) }
  0x9d   : > { %301 = vadd.xlane.f32.xlu1 (!%p1204_p2), %v300_v15  ;;  %v297_v25 = vadd.f32 (!%p1204_p2), %v281_v17, %v280_v16  ;;  %v287_v27 = vmul.f32 (!%p1204_p2), %v2204_v20, %v2204_v20  ;;  %v2224_v31 = vld [vmem:[%s2131_s7 + $0x68] sm:$0xff] (!%p1204_p2)  ;;  %v292_v33 = vmul.f32 (!%p1204_p2), %v2215_v28, %v2215_v28  ;;  %v293_v34 = vmul.f32 (!%p1204_p2), %v2218_v29, %v2218_v29  ;;  %v359_v3 = vld [vmem:[#allocation6] sm:$0x3] (!%p1204_p2) }
  0x9e   : > { %295 = vadd.xlane.f32.xlu0 (!%p1204_p2), %v294_v21  ;;  %v309_v32 = vadd.f32 (!%p1204_p2), %v289_v24, %v288_v23  ;;  %v290_v36 = vmul.f32 (!%p1204_p2), %v2221_v30, %v2221_v30  ;;  %v291_v37 = vmul.f32 (!%p1204_p2), %v2224_v31, %v2224_v31  ;;  %v363_v61 = vsub.s32 (!%p1204_p2), 0, %v362_v54 }
  0x9f   : > { %v306_v35 = vadd.f32 (!%p1204_p2), %v287_v27, %v286_v26  ;;  %v315_v38 = vadd.f32 (!%p1204_p2), %v293_v34, %v292_v33  ;;  %v367_v4 = vsub.s32 (!%p1204_p2), 1, %v362_v54 }
  0xa0   : > { %v312_v39 = vadd.f32 %v291_v37, %v290_v36  ;;  %v364_v16 = vrot.slane %v359_v3, %v363_v61 }
  0xa1   : > { %304 = vadd.xlane.f32.xlu1 %v303_v22  ;;  %v368_v17 = vrot.slane %v359_v3, %v367_v4 }
  0xa2   : > { %298 = vadd.xlane.f32.xlu0 %v297_v25 }
  0xa5   : > { %310 = vadd.xlane.f32.xlu1 %v309_v32 }
  0xa6   : > { %307 = vadd.xlane.f32.xlu0 %v306_v35 }
  0xa9   : > { %316 = vadd.xlane.f32.xlu1 %v315_v38 }
  0xaa   : > { %313 = vadd.xlane.f32.xlu0 %v312_v39 }
 0x12a   : > { %v302_v40 = vpop.xlane.xlu1 %301 }
 0x12b   : > { %v321_v41 = vmul.f32 0.00390625, %v302_v40  ;;  %v296_v42 = vpop.xlane.xlu0 %295 }
 0x12c   : > { %v319_v43 = vmul.f32 0.00390625, %v296_v42 }
 0x12d   : > { %v329_v44 = vadd.f32 1e-06, %v321_v41 }
 0x12e   : > { %v327_v45 = vadd.f32 1e-06, %v319_v43  ;;  %v305_v46 = vpop.xlane.xlu1 %304 }
 0x12f   : > { %1460 = vrsqrt.f32 %v329_v44  ;;  %v322_v48 = vmul.f32 0.00390625, %v305_v46  ;;  %v299_v49 = vpop.xlane.xlu0 %298 }
 0x130   : > { %1462 = vrsqrt.f32 %v327_v45  ;;  %v320_v50 = vmul.f32 0.00390625, %v299_v49 }
 0x131   : > { %v330_v51 = vadd.f32 1e-06, %v322_v48 }
 0x132   : > { %v328_v52 = vadd.f32 1e-06, %v320_v50  ;;  %v311_v53 = vpop.xlane.xlu1 %310 }
 0x133   : > { %1464 = vrsqrt.f32 %v330_v51  ;;  %v324_v55 = vmul.f32 0.00390625, %v311_v53  ;;  %v308_v56 = vpop.xlane.xlu0 %307 }
 0x134   : > { %1466 = vrsqrt.f32 %v328_v52  ;;  %v323_v57 = vmul.f32 0.00390625, %v308_v56 }
 0x135   : > { %v332_v58 = vadd.f32 1e-06, %v324_v55 }
 0x136   : > { %v331_v59 = vadd.f32 1e-06, %v323_v57  ;;  %v317_v60 = vpop.xlane.xlu1 %316 }
 0x137   : > { %1468 = vrsqrt.f32 %v332_v58  ;;  %v326_v62 = vmul.f32 0.00390625, %v317_v60  ;;  %v314_v63 = vpop.xlane.xlu0 %313 }
 0x138   : > { %1470 = vrsqrt.f32 %v331_v59  ;;  %v325_v6 = vmul.f32 0.00390625, %v314_v63 }
 0x139   : > { %v1461_v9 = vpop.eup %1460  ;;  %v334_v10 = vadd.f32 1e-06, %v326_v62 }
 0x13a   : > { %v1463_v11 = vpop.eup %1462  ;;  %v333_v15 = vadd.f32 1e-06, %v325_v6  ;;  %v347_v21 = vmul.f32 %v1461_v9, %v2155_v0  ;;  %v348_v22 = vmul.f32 %v1461_v9, %v2158_v1 }
 0x13b   : > { %1472 = vrsqrt.f32 %v334_v10  ;;  %v343_v24 = vmul.f32 %v1463_v11, %v2161_v2  ;;  %v344_v25 = vmul.f32 %v1463_v11, %v2168_v5 }
 0x13c   : > { %1474 = vrsqrt.f32 %v333_v15  ;;  %v375_v35 = vmul.f32 %v364_v16, %v347_v21  ;;  %v376_v36 = vmul.f32 %v368_v17, %v348_v22 }
 0x13d   : > { %v1465_v23 = vpop.eup %1464  ;;  %v371_v38 = vmul.f32 %v364_v16, %v343_v24  ;;  %v372_v39 = vmul.f32 %v368_v17, %v344_v25 }
 0x13e   : > { %v1467_v26 = vpop.eup %1466  ;;  %v349_v27 = vmul.f32 %v1465_v23, %v2173_v7  ;;  %v350_v32 = vmul.f32 %v1465_v23, %v2176_v8 }
 0x13f   : > { %v345_v33 = vmul.f32 %v1467_v26, %v2185_v12  ;;  %v346_v34 = vmul.f32 %v1467_v26, %v2188_v13 }
 0x140   : > { %v377_v0 = vmul.f32 %v364_v16, %v349_v27  ;;  %v378_v37 = vmul.f32 %v368_v17, %v350_v32 }
 0x141   : > { %v1469_v1 = vpop.eup %1468  ;;  %v373_v40 = vmul.f32 %v364_v16, %v345_v33  ;;  %v374_v2 = vmul.f32 %v368_v17, %v346_v34 }
 0x142   : > { %v1471_v41 = vpop.eup %1470  ;;  %v389_v5 = vpack.c.bf16 %v377_v0, %v375_v35  ;;  %v390_v42 = vpack.c.bf16 %v378_v37, %v376_v36  ;;  %v353_v7 = vmul.f32 %v1469_v1, %v2191_v14  ;;  %v354_v8 = vmul.f32 %v1469_v1, %v2198_v18 }
 0x143   : > { %v387_v43 = vpack.c.bf16 %v373_v40, %v371_v38  ;;  %v388_v12 = vpack.c.bf16 %v374_v2, %v372_v39  ;;  %v351_v13 = vmul.f32 %v1471_v41, %v2201_v19  ;;  %v352_v44 = vmul.f32 %v1471_v41, %v2204_v20 }
 0x144   : > { %397 = vst [vmem:[#allocation2 + $0x10] sm:$0xff] %v389_v5  ;;  %398 = vst [vmem:[#allocation2 + $0x18] sm:$0xff] %v390_v42  ;;  %v381_v45 = vmul.f32 %v364_v16, %v353_v7  ;;  %v382_v46 = vmul.f32 %v368_v17, %v354_v8 }
 0x145   : > { %v1473_v47 = vpop.eup %1472  ;;  %395 = vst [vmem:[#allocation2] sm:$0xff] %v387_v43  ;;  %396 = vst [vmem:[#allocation2 + $0x8] sm:$0xff] %v388_v12  ;;  %v379_v48 = vmul.f32 %v364_v16, %v351_v13  ;;  %v380_v49 = vmul.f32 %v368_v17, %v352_v44 }
 0x146   : > { %v1475_v50 = vpop.eup %1474  ;;  %v357_v14 = vmul.f32 %v1473_v47, %v2215_v28  ;;  %v358_v18 = vmul.f32 %v1473_v47, %v2218_v29 }
 0x147   : > { %v391_v51 = vpack.c.bf16 %v381_v45, %v379_v48  ;;  %v392_v52 = vpack.c.bf16 %v382_v46, %v380_v49  ;;  %v355_v19 = vmul.f32 %v1475_v50, %v2221_v30  ;;  %v356_v20 = vmul.f32 %v1475_v50, %v2224_v31 }
 0x148   : > { %v385_v53 = vmul.f32 %v364_v16, %v357_v14  ;;  %v386_v54 = vmul.f32 %v368_v17, %v358_v18 }
 0x149   : > { %399 = vst [vmem:[#allocation2 + $0x20] sm:$0xff] %v391_v51  ;;  %400 = vst [vmem:[#allocation2 + $0x28] sm:$0xff] %v392_v52  ;;  %v383_v55 = vmul.f32 %v364_v16, %v355_v19  ;;  %v384_v56 = vmul.f32 %v368_v17, %v356_v20 }
 0x14b   : > { %v393_v57 = vpack.c.bf16 %v385_v53, %v383_v55  ;;  %v394_v58 = vpack.c.bf16 %v386_v54, %v384_v56 }
 0x14d   : > { %401 = vst [vmem:[#allocation2 + $0x30] sm:$0xff] %v393_v57  ;;  %402 = vst [vmem:[#allocation2 + $0x38] sm:$0xff] %v394_v58 }
 0x14e PF: > { %v1476_v28 = vld [vmem:[%s2142_s11 + $0x4] ss:$16 sps:$4 sm:$0xff]   ;;  %v1478_v29 = vld [vmem:[%s2142_s11 + $0xc] ss:$16 sps:$4 sm:$0xff]   ;;  %v1480_v30 = vld [vmem:[%s2142_s11] ss:$16 sps:$4 sm:$0xff]  }
 0x14f   : > { %795 = vmatprep.subr.bf16.mxu0 %v1476_v28  ;;  %v1481_v31 = vld [vmem:[%s2142_s11 + $0x8] ss:$16 sps:$4 sm:$0xff]   ;;  %868 = vmatprep.subr.bf16.mxu1 %v1478_v29  ;;  %v1482_v59 = vld [vmem:[%s2142_s11 + $0x24] ss:$16 sps:$4 sm:$0xff]   ;;  %v1484_v60 = vld [vmem:[%s2142_s11 + $0x2c] ss:$16 sps:$4 sm:$0xff]  }
 0x150   : > { %796 = vmatpush1.bf16.msra.mxu0 %v1480_v30  ;;  %869 = vmatpush1.bf16.msra.mxu1 %v1481_v31  ;;  %v1486_v61 = vld [vmem:[%s2142_s11 + $0x20] ss:$16 sps:$4 sm:$0xff]   ;;  %v1487_v62 = vld [vmem:[%s2142_s11 + $0x28] ss:$16 sps:$4 sm:$0xff]   ;;  %v1488_v63 = vld [vmem:[%s2142_s11 + $0x44] ss:$16 sps:$4 sm:$0xff]  }
 0x151   : > { %797 = vmatprep.subr.bf16.mxu0 %v1482_v59  ;;  %870 = vmatprep.subr.bf16.mxu1 %v1484_v60  ;;  %v1490_v3 = vld [vmem:[%s2142_s11 + $0x4c] ss:$16 sps:$4 sm:$0xff]   ;;  %v1492_v4 = vld [vmem:[%s2142_s11 + $0x40] ss:$16 sps:$4 sm:$0xff]   ;;  %v1493_v6 = vld [vmem:[%s2142_s11 + $0x48] ss:$16 sps:$4 sm:$0xff]  }
 0x152   : > { %v1494_v9 = vld [vmem:[%s2142_s11 + $0x64] ss:$16 sps:$4 sm:$0xff]   ;;  %v1496_v10 = vld [vmem:[%s2142_s11 + $0x6c] ss:$16 sps:$4 sm:$0xff]   ;;  %v1498_v11 = vld [vmem:[%s2142_s11 + $0x60] ss:$16 sps:$4 sm:$0xff]  }
 0x153   : > { %v1499_v15 = vld [vmem:[%s2142_s11 + $0x68] ss:$16 sps:$4 sm:$0xff]   ;;  %v1500_v16 = vld [vmem:[%s2142_s11 + $0x84] ss:$16 sps:$4 sm:$0xff]   ;;  %v1502_v17 = vld [vmem:[%s2142_s11 + $0x8c] ss:$16 sps:$4 sm:$0xff]  }
 0x154   : > { %798 = vmatpush1.bf16.msra.mxu0 %v1486_v61  ;;  %871 = vmatpush1.bf16.msra.mxu1 %v1487_v62  ;;  %v1504_v21 = vld [vmem:[%s2142_s11 + $0x80] ss:$16 sps:$4 sm:$0xff]   ;;  %v1505_v22 = vld [vmem:[%s2142_s11 + $0x88] ss:$16 sps:$4 sm:$0xff]   ;;  %v1506_v23 = vld [vmem:[%s2142_s11 + $0xa4] ss:$16 sps:$4 sm:$0xff]  }
 0x155   : > { %799 = vmatprep.subr.bf16.mxu0 %v1488_v63  ;;  %872 = vmatprep.subr.bf16.mxu1 %v1490_v3  ;;  %v1508_v24 = vld [vmem:[%s2142_s11 + $0xac] ss:$16 sps:$4 sm:$0xff]   ;;  %v1510_v25 = vld [vmem:[%s2142_s11 + $0xa0] ss:$16 sps:$4 sm:$0xff]   ;;  %v1511_v26 = vld [vmem:[%s2142_s11 + $0xa8] ss:$16 sps:$4 sm:$0xff]  }
 0x156   : > { %v1512_v27 = vld [vmem:[%s2142_s11 + $0xc4] ss:$16 sps:$4 sm:$0xff]   ;;  %v1514_v32 = vld [vmem:[%s2142_s11 + $0xcc] ss:$16 sps:$4 sm:$0xff]   ;;  %v1516_v33 = vld [vmem:[%s2142_s11 + $0xc0] ss:$16 sps:$4 sm:$0xff]  }
 0x157   : > { %v1517_v34 = vld [vmem:[%s2142_s11 + $0xc8] ss:$16 sps:$4 sm:$0xff]   ;;  %v1518_v35 = vld [vmem:[%s2142_s11 + $0xe4] ss:$16 sps:$4 sm:$0xff]   ;;  %v1520_v36 = vld [vmem:[%s2142_s11 + $0xec] ss:$16 sps:$4 sm:$0xff]  }
 0x158   : > { %800 = vmatpush1.bf16.msra.mxu0 %v1492_v4  ;;  %873 = vmatpush1.bf16.msra.mxu1 %v1493_v6  ;;  %v1522_v0 = vld [vmem:[%s2142_s11 + $0xe0] ss:$16 sps:$4 sm:$0xff]   ;;  %v1523_v37 = vld [vmem:[%s2142_s11 + $0xe8] ss:$16 sps:$4 sm:$0xff]   ;;  %v1524_v1 = vld [vmem:[%s2142_s11 + $0x104] ss:$16 sps:$4 sm:$0xff]  }
 0x159   : > { %801 = vmatprep.subr.bf16.mxu0 %v1494_v9  ;;  %874 = vmatprep.subr.bf16.mxu1 %v1496_v10  ;;  %v1526_v38 = vld [vmem:[%s2142_s11 + $0x10c] ss:$16 sps:$4 sm:$0xff]   ;;  %v1528_v39 = vld [vmem:[%s2142_s11 + $0x100] ss:$16 sps:$4 sm:$0xff]   ;;  %v1529_v40 = vld [vmem:[%s2142_s11 + $0x108] ss:$16 sps:$4 sm:$0xff]  }
 0x15a   : > { %v1530_v2 = vld [vmem:[%s2142_s11 + $0x124] ss:$16 sps:$4 sm:$0xff]   ;;  %v1532_v41 = vld [vmem:[%s2142_s11 + $0x12c] ss:$16 sps:$4 sm:$0xff]   ;;  %v1534_v5 = vld [vmem:[%s2142_s11 + $0x120] ss:$16 sps:$4 sm:$0xff]  }
 0x15b   : > { %v1535_v42 = vld [vmem:[%s2142_s11 + $0x128] ss:$16 sps:$4 sm:$0xff]   ;;  %v1536_v7 = vld [vmem:[%s2142_s11 + $0x144] ss:$16 sps:$4 sm:$0xff]   ;;  %v1538_v8 = vld [vmem:[%s2142_s11 + $0x14c] ss:$16 sps:$4 sm:$0xff]  }
 0x15c   : > { %802 = vmatpush1.bf16.msra.mxu0 %v1498_v11  ;;  %875 = vmatpush1.bf16.msra.mxu1 %v1499_v15  ;;  %v1540_v43 = vld [vmem:[%s2142_s11 + $0x140] ss:$16 sps:$4 sm:$0xff]   ;;  %v1541_v12 = vld [vmem:[%s2142_s11 + $0x148] ss:$16 sps:$4 sm:$0xff]   ;;  %v1542_v13 = vld [vmem:[%s2142_s11 + $0x164] ss:$16 sps:$4 sm:$0xff]  }
 0x15d   : > { %803 = vmatprep.subr.bf16.mxu0 %v1500_v16  ;;  %876 = vmatprep.subr.bf16.mxu1 %v1502_v17  ;;  %v1544_v44 = vld [vmem:[%s2142_s11 + $0x16c] ss:$16 sps:$4 sm:$0xff]   ;;  %v1546_v46 = vld [vmem:[%s2142_s11 + $0x160] ss:$16 sps:$4 sm:$0xff]   ;;  %v1547_v47 = vld [vmem:[%s2142_s11 + $0x168] ss:$16 sps:$4 sm:$0xff]  }
 0x15e   : > { %v404_v45 = vld [vmem:[#allocation2 + $0x8] sm:$0xff]  ;;  %v1552_v50 = vld [vmem:[%s2142_s11 + $0x180] ss:$16 sps:$4 sm:$0xff]   ;;  %v406_v30 = vld [vmem:[#allocation2 + $0x18] sm:$0xff]  ;;  %s2476_s18 = sld [smem:[#allocation16_spill]]  ;;  %s2477_s30 = sld [smem:[#allocation17_spill]] }
 0x15f   : > { %827 = vmatprep.mubr.bf16.mxu0 %v404_v45  ;;  %900 = vmatprep.mubr.bf16.mxu1 %v404_v45  ;;  %v1548_v48 = vld [vmem:[%s2142_s11 + $0x184] ss:$16 sps:$4 sm:$0xff]   ;;  %v1550_v49 = vld [vmem:[%s2142_s11 + $0x18c] ss:$16 sps:$4 sm:$0xff]   ;;  %v1553_v14 = vld [vmem:[%s2142_s11 + $0x188] ss:$16 sps:$4 sm:$0xff]  }
 0x160   : > { %804 = vmatpush1.bf16.msra.mxu0 %v1504_v21  ;;  %877 = vmatpush1.bf16.msra.mxu1 %v1505_v22  ;;  %v1554_v18 = vld [vmem:[%s2142_s11 + $0x1a4] ss:$16 sps:$4 sm:$0xff]   ;;  %v1556_v51 = vld [vmem:[%s2142_s11 + $0x1ac] ss:$16 sps:$4 sm:$0xff]   ;;  %v1558_v52 = vld [vmem:[%s2142_s11 + $0x1a0] ss:$16 sps:$4 sm:$0xff]  }
 0x161   : > { %805 = vmatprep.subr.bf16.mxu0 %v1506_v23  ;;  %878 = vmatprep.subr.bf16.mxu1 %v1508_v24  ;;  %v1559_v19 = vld [vmem:[%s2142_s11 + $0x1a8] ss:$16 sps:$4 sm:$0xff]   ;;  %v1560_v20 = vld [vmem:[%s2142_s11 + $0x1c4] ss:$16 sps:$4 sm:$0xff]   ;;  %v1562_v53 = vld [vmem:[%s2142_s11 + $0x1cc] ss:$16 sps:$4 sm:$0xff]  }
 0x162   : > { %v1564_v54 = vld [vmem:[%s2142_s11 + $0x1c0] ss:$16 sps:$4 sm:$0xff]   ;;  %v1565_v55 = vld [vmem:[%s2142_s11 + $0x1c8] ss:$16 sps:$4 sm:$0xff]   ;;  %v1566_v56 = vld [vmem:[%s2142_s11 + $0x1e4] ss:$16 sps:$4 sm:$0xff]  }
 0x163   : > { %v1568_v57 = vld [vmem:[%s2142_s11 + $0x1ec] ss:$16 sps:$4 sm:$0xff]   ;;  %v1570_v58 = vld [vmem:[%s2142_s11 + $0x1e0] ss:$16 sps:$4 sm:$0xff]   ;;  %v1571_v28 = vld [vmem:[%s2142_s11 + $0x1e8] ss:$16 sps:$4 sm:$0xff]  }
 0x164   : > { %806 = vmatpush1.bf16.msra.mxu0 %v1510_v25  ;;  %879 = vmatpush1.bf16.msra.mxu1 %v1511_v26  ;;  %v403_v29 = vld [vmem:[#allocation2] sm:$0xff]  ;;  %v405_v31 = vld [vmem:[#allocation2 + $0x10] sm:$0xff]  ;;  %v408_v59 = vld [vmem:[#allocation2 + $0x28] sm:$0xff]  ;;  %s1287_s26 = sshll.u32 %s2476_s18, 2  ;;  %s1311_s4 = sshll.u32 %s2477_s30, 6 }
 0x165   : > { %807 = vmatprep.subr.bf16.mxu0 %v1512_v27  ;;  %880 = vmatprep.subr.bf16.mxu1 %v1514_v32  ;;  %v407_v60 = vld [vmem:[#allocation2 + $0x20] sm:$0xff]  ;;  %v410_v61 = vld [vmem:[#allocation2 + $0x38] sm:$0xff]  ;;  %v409_v62 = vld [vmem:[#allocation2 + $0x30] sm:$0xff]  ;;  %s1067_s6 = sadd.s32 %s1311_s4, %s1287_s26  ;;  %s1070_s0 = sshll.u32 %s2151_s8, 4  ;;  %s2334_s0 = int_to_ptr.vmem [resolvable:$true] %s1070_s0 }
 0x166   : > { %s1289_s22 = sshll.u32 %s1067_s6, 6  ;;  %s2478_s23 = sld [smem:[#allocation26_spill]] }
 0x167   : > { %s2342_s27 = scalar_lea.sflag [#allocation5], %s251_s21  ;;  %s1660_s7 = scalar_lea.vmem %s2334_s0, 2048 }
 0x168   : > { %808 = vmatpush1.bf16.msra.mxu0 %v1516_v33  ;;  %881 = vmatpush1.bf16.msra.mxu1 %v1517_v34  ;;  %p1661_p6 = scmp.ne.s32.totalorder %s2334_s0, %s1660_s7  ;;  %p2480_p9 = scmp.ne.s32.totalorder %s2461_s15, 0 }
 0x169   : > { %809 = vmatprep.subr.bf16.mxu0 %v1518_v35  ;;  %882 = vmatprep.subr.bf16.mxu1 %v1520_v36  ;;  %s1822_s10 = smov [#allocation9]  }
 0x16a   : > { %p1662_p8 = pnand %p1661_p6, %p2480_p9  ;;  %s1664_s28 = sshll.u32 %s1822_s10, 4  ;;  %s1665_s28 = int_to_ptr.vmem [resolvable:$false] %s1664_s28 }
 0x16b   : > { %s1666_s11 = scalar_lea.vmem %s1665_s28, 4096  ;;  %p1667_p5 = scmp.lt.s32.totalorder %s2334_s0, %s1665_s28 }
 0x16c   : > { %810 = vmatpush1.bf16.msra.mxu0 %v1522_v0  ;;  %883 = vmatpush1.bf16.msra.mxu1 %v1523_v37  ;;  %s2479_s3 = smov %s2478_s23  ;;  %s2332_s24 = scalar_lea.hbm %s2478_s23, %s1289_s22 }
 0x16d   : > { %811 = vmatprep.subr.bf16.mxu0 %v1524_v1  ;;  %884 = vmatprep.subr.bf16.mxu1 %v1526_v38  ;;  %p1663_p0 = pneg %p1662_p8  ;;  %p1668_p12 = scmp.lt.s32.totalorder %s1666_s11, %s1660_s7 }
 0x16f   : > { %p1669_p13 = por %p1668_p12, %p1667_p5 }
 0x170   : > { %812 = vmatpush1.bf16.msra.mxu0 %v1528_v39  ;;  %885 = vmatpush1.bf16.msra.mxu1 %v1529_v40 }
 0x171   : > { %813 = vmatprep.subr.bf16.mxu0 %v1530_v2  ;;  %886 = vmatprep.subr.bf16.mxu1 %v1532_v41  ;;  %p1670_p10 = pnand %p1669_p13, %p1663_p0 }
 0x174   : > { %814 = vmatpush1.bf16.msra.mxu0 %v1534_v5  ;;  %887 = vmatpush1.bf16.msra.mxu1 %v1535_v42 }
 0x175   : > { %815 = vmatprep.subr.bf16.mxu0 %v1536_v7  ;;  %888 = vmatprep.subr.bf16.mxu1 %v1538_v8 }
 0x178   : > { %816 = vmatpush1.bf16.msra.mxu0 %v1540_v43  ;;  %889 = vmatpush1.bf16.msra.mxu1 %v1541_v12 }
 0x179   : > { %817 = vmatprep.subr.bf16.mxu0 %v1542_v13  ;;  %890 = vmatprep.subr.bf16.mxu1 %v1544_v44 }
 0x17c   : > { %818 = vmatpush1.bf16.msra.mxu0 %v1546_v46  ;;  %891 = vmatpush1.bf16.msra.mxu1 %v1547_v47 }
 0x17d   : > { %819 = vmatprep.subr.bf16.mxu0 %v1548_v48  ;;  %892 = vmatprep.subr.bf16.mxu1 %v1550_v49 }
 0x180   : > { %820 = vmatpush1.bf16.msra.mxu0 %v1552_v50  ;;  %893 = vmatpush1.bf16.msra.mxu1 %v1553_v14 }
 0x181   : > { %821 = vmatprep.subr.bf16.mxu0 %v1554_v18  ;;  %894 = vmatprep.subr.bf16.mxu1 %v1556_v51 }
 0x184   : > { %822 = vmatpush1.bf16.msra.mxu0 %v1558_v52  ;;  %895 = vmatpush1.bf16.msra.mxu1 %v1559_v19 }
 0x185   : > { %823 = vmatprep.subr.bf16.mxu0 %v1560_v20  ;;  %896 = vmatprep.subr.bf16.mxu1 %v1562_v53 }
 0x188   : > { %824 = vmatpush1.bf16.msra.mxu0 %v1564_v54  ;;  %897 = vmatpush1.bf16.msra.mxu1 %v1565_v55 }
 0x189   : > { %825 = vmatprep.subr.bf16.mxu0 %v1566_v56  ;;  %898 = vmatprep.subr.bf16.mxu1 %v1568_v57 }
 0x18c   : > { %826 = vmatpush1.bf16.msra.mxu0 %v1570_v58  ;;  %899 = vmatpush1.bf16.msra.mxu1 %v1571_v28 }
 0x18f   : > { %828 = vmatmul.mubr.bf16.vlgmr.msra.gmra.mrb[0].mxu0 %v403_v29  ;;  %901 = vmatmul.mubr.bf16.vlgmr.msra.gmra.mrb[0].mxu1 %v403_v29 }
 0x190   : > { %837 = vmatprep.mubr.bf16.mxu0 %v406_v30  ;;  %910 = vmatprep.mubr.bf16.mxu1 %v406_v30 }
 0x197   : > { %838 = vmatmul.mubr.bf16.gmra.mrb[4].mxu0 %v405_v31  ;;  %911 = vmatmul.mubr.bf16.gmra.mrb[4].mxu1 %v405_v31 }
 0x198   : > { %847 = vmatprep.mubr.bf16.mxu0 %v408_v59  ;;  %920 = vmatprep.mubr.bf16.mxu1 %v408_v59 }
 0x19f   : > { %848 = vmatmul.mubr.bf16.gmra.mrb[8].mxu0 %v407_v60  ;;  %921 = vmatmul.mubr.bf16.gmra.mrb[8].mxu1 %v407_v60 }
 0x1a0   : > { %857 = vmatprep.mubr.bf16.mxu0 %v410_v61  ;;  %930 = vmatprep.mubr.bf16.mxu1 %v410_v61 }
 0x1a7   : > { %858 = vmatmul.mubr.bf16.gmra.mrb[12].mxu0 %v409_v62  ;;  %931 = vmatmul.mubr.bf16.gmra.mrb[12].mxu1 %v409_v62 }
 0x262   : > { %v829_v63 = vpop.f32.mrb[0].mxu0  ;;  %v902_v3 = vpop.f32.mrb[0].mxu1 }
 0x263   : > { %v831_v4 = vpop.f32.mrb[1].mxu0  ;;  %v904_v6 = vpop.f32.mrb[1].mxu1 }
 0x264   : > { %v1295_v9 = vpack.c.bf16 %v831_v4, %v829_v63  ;;  %v1296_v10 = vpack.c.bf16 %v904_v6, %v902_v3  ;;  %v833_v11 = vpop.f32.mrb[2].mxu0  ;;  %v906_v15 = vpop.f32.mrb[2].mxu1 }
 0x265   : > { %v835_v16 = vpop.f32.mrb[3].mxu0  ;;  %v908_v17 = vpop.f32.mrb[3].mxu1 }
 0x266   : > { %1037 = vst [vmem:[%s2151_s8] sm:$0xff] %v1295_v9  ;;  %1038 = vst [vmem:[%s2151_s8 + $0x8] sm:$0xff] %v1296_v10  ;;  %v1297_v21 = vpack.c.bf16 %v835_v16, %v833_v11  ;;  %v1298_v22 = vpack.c.bf16 %v908_v17, %v906_v15 }
 0x268   : > { %1039 = vst [vmem:[%s2151_s8 + $0x10] sm:$0xff] %v1297_v21  ;;  %1040 = vst [vmem:[%s2151_s8 + $0x18] sm:$0xff] %v1298_v22 }
 0x26a   : > { %v839_v23 = vpop.f32.mrb[4].mxu0  ;;  %v912_v24 = vpop.f32.mrb[4].mxu1 }
 0x26b   : > { %v841_v25 = vpop.f32.mrb[5].mxu0  ;;  %v914_v26 = vpop.f32.mrb[5].mxu1 }
 0x26c   : > { %v1299_v27 = vpack.c.bf16 %v841_v25, %v839_v23  ;;  %v1300_v32 = vpack.c.bf16 %v914_v26, %v912_v24  ;;  %v843_v33 = vpop.f32.mrb[6].mxu0  ;;  %v916_v34 = vpop.f32.mrb[6].mxu1 }
 0x26d   : > { %v845_v35 = vpop.f32.mrb[7].mxu0  ;;  %v918_v36 = vpop.f32.mrb[7].mxu1 }
 0x26e   : > { %1041 = vst [vmem:[%s2151_s8 + $0x20] sm:$0xff] %v1299_v27  ;;  %1042 = vst [vmem:[%s2151_s8 + $0x28] sm:$0xff] %v1300_v32  ;;  %v1301_v0 = vpack.c.bf16 %v845_v35, %v843_v33  ;;  %v1302_v37 = vpack.c.bf16 %v918_v36, %v916_v34 }
 0x270   : > { %1043 = vst [vmem:[%s2151_s8 + $0x30] sm:$0xff] %v1301_v0  ;;  %1044 = vst [vmem:[%s2151_s8 + $0x38] sm:$0xff] %v1302_v37 }
 0x272   : > { %v849_v1 = vpop.f32.mrb[8].mxu0  ;;  %v922_v38 = vpop.f32.mrb[8].mxu1 }
 0x273   : > { %v851_v39 = vpop.f32.mrb[9].mxu0  ;;  %v924_v40 = vpop.f32.mrb[9].mxu1 }
 0x274   : > { %v1303_v2 = vpack.c.bf16 %v851_v39, %v849_v1  ;;  %v1304_v41 = vpack.c.bf16 %v924_v40, %v922_v38  ;;  %v853_v5 = vpop.f32.mrb[10].mxu0  ;;  %v926_v42 = vpop.f32.mrb[10].mxu1 }
 0x275   : > { %v855_v7 = vpop.f32.mrb[11].mxu0  ;;  %v928_v8 = vpop.f32.mrb[11].mxu1 }
 0x276   : > { %1045 = vst [vmem:[%s2151_s8 + $0x40] sm:$0xff] %v1303_v2  ;;  %1046 = vst [vmem:[%s2151_s8 + $0x48] sm:$0xff] %v1304_v41  ;;  %v1305_v43 = vpack.c.bf16 %v855_v7, %v853_v5  ;;  %v1306_v12 = vpack.c.bf16 %v928_v8, %v926_v42 }
 0x278   : > { %1047 = vst [vmem:[%s2151_s8 + $0x50] sm:$0xff] %v1305_v43  ;;  %1048 = vst [vmem:[%s2151_s8 + $0x58] sm:$0xff] %v1306_v12 }
 0x27a   : > { %v859_v13 = vpop.f32.mrb[12].mxu0  ;;  %v932_v44 = vpop.f32.mrb[12].mxu1 }
 0x27b   : > { %v861_v45 = vpop.f32.mrb[13].mxu0  ;;  %v934_v46 = vpop.f32.mrb[13].mxu1 }
 0x27c   : > { %v1307_v47 = vpack.c.bf16 %v861_v45, %v859_v13  ;;  %v1308_v48 = vpack.c.bf16 %v934_v46, %v932_v44  ;;  %v863_v49 = vpop.f32.mrb[14].mxu0  ;;  %v936_v50 = vpop.f32.mrb[14].mxu1 }
 0x27d   : > { %v865_v14 = vpop.f32.mrb[15].mxu0  ;;  %v938_v18 = vpop.f32.mrb[15].mxu1 }
 0x27e   : > { %1049 = vst [vmem:[%s2151_s8 + $0x60] sm:$0xff] %v1307_v47  ;;  %1050 = vst [vmem:[%s2151_s8 + $0x68] sm:$0xff] %v1308_v48  ;;  %v1309_v51 = vpack.c.bf16 %v865_v14, %v863_v49  ;;  %v1310_v52 = vpack.c.bf16 %v938_v18, %v936_v50 }
 0x280   : > { %1051 = vst [vmem:[%s2151_s8 + $0x70] sm:$0xff] %v1309_v51  ;;  %1052 = vst [vmem:[%s2151_s8 + $0x78] sm:$0xff] %v1310_v52 }
 0x281   : > { %1673 = shalt.err (!%p1670_p10)
}
 0x282   : > { %s1674_s21 = scalar_lea.hbm %s2332_s24, 2048  ;;  %s1678_s29 = scalar_lea.hbm %s2479_s3, 8192 }
 0x283   : > { %p1675_p11 = scmp.ne.s32.totalorder %s2332_s24, %s1674_s21  ;;  %p1679_p4 = scmp.lt.u32.totalorder %s2332_s24, %s2479_s3 }
 0x284   : > { %p1680_p7 = scmp.lt.u32.totalorder %s1678_s29, %s1674_s21  ;;  %p1682_p6 = scmp.lt.u32.totalorder %s1674_s21, %s2332_s24 }
 0x285   : > { %p1676_p1 = pnand %p1675_p11, %p2480_p9 }
 0x286   : > { %p1681_p2 = por %p1680_p7, %p1679_p4 }
 0x287   : > { %p1677_p3 = pneg %p1676_p1 }
 0x288   : > { %p1683_p8 = por %p1682_p6, %p1681_p2 }
 0x28a   : > { %p1684_p0 = pnand %p1683_p8, %p1677_p3 }
 0x28c   : > { %1687 = shalt.err (!%p1684_p0)
}
 0x28d   : > { %s1823_s26 = smov 256   ;;  %s1824_s4 = smov 512  }
 0x28e   : > { %s1825_s6 = smov 16  }
 0x28f   : > { %1320 = dma.vmem_to_hbm [thread:$0]  (%p2480_p9), %s2334_s0, 2048, %s2332_s24, %s2342_s27, %s1823_s26, %s1824_s4, %s1825_s6  }
 0x290 PF: > { %p1340_p5 = scmp.ge.s32.totalorder %s1814_s25, 2  ;;  %s1085_s22 = sand.u32 1, %s1762_s12  }
 0x291   : > { %p2481_p12 = scmp.ne.s32.totalorder %s2462_s9, 0  ;;  %s1086_s17 = scalar_lea.sflag [#allocation5], %s1085_s22 }
 0x293   : > { %p1334_p13 = pnand %p1340_p5, %p2481_p12 }
 0x295   : > { %1757 = dma.done.wait (!%p1334_p13), %s1086_s17, 2048  }
 0x296   : > { %1759 = vsyncadd (!%p1334_p13), %s1086_s17, 4294965248  ;;  %s20_s25 = sadd.s32 1, %s1814_s25   ;;  %s2483_s15 = sld [smem:[#allocation24_spill]] }
 0x297   : > { %p2371_p10 = scmp.ge.s32.totalorder %s20_s25, 6   ;;  %s2484_s0 = sld [smem:[#allocation14_spill]] }
 0x298   : > { %s2485_s17 = sld [smem:[#allocation23_spill]]  ;;  %s2486_s23 = sld [smem:[#allocation15_spill]] }
 0x299   : > { %s2487_s24 = sld [smem:[#allocation22_spill]]  ;;  %s2488_s21 = sld [smem:[#allocation18_spill]] }
 0x29a   : > { %s2489_s22 = sld [smem:[#allocation19_spill]]  ;;  %s2490_s9 = sld [smem:[#allocation20_spill]] }
 0x29b   : > { %s2491_s27 = sld [smem:[#allocation21_spill]]  ;;  %s2493_s12 = smov %s1766_s13 }
 0x29c   : > { %s2494_s13 = smov %s1770_s14  ;;  %s2495_s14 = smov %s2483_s15 }
 0x29d   : > { %s2496_s15 = smov %s1778_s16  ;;  %s2497_s16 = smov %s2484_s0 }
 0x29e   : > { %s2498_s18 = smov %s1790_s19  ;;  %s2499_s19 = smov %s2486_s23 }
 0x29f   : > { %s2500_s20 = smov %s2487_s24  ;;  %19 = sbr.rel (!%p2371_p10) target bundleno = 14 (0xe), region = 96 }
 0x2a0   : > { %s2501_s23 = smov %s2490_s9 }
 0x2a1   : > { %s2502_s24 = smov %s2491_s27 }
 0x2a6   :  { %1091 = vsyncpa [#allocation4], 1 }
 0x2a7   :  { %1093 = vsyncpa [#allocation4 + $0x1], 1 }
 0x2a8   :  { %1094 = vsyncpa [#allocation7], 1 }
 0x2a9   :  { %1095 = vsyncpa [#allocation5], 1 }
 0x2aa   :  { %1097 = vsyncpa [#allocation5 + $0x1], 1 }

</bundles_post_ra>
